<compile_context>
chip_gen: v6e
topology: v6e:2x2x1
jax: 0.10.0
libtpu: 0.0.40
codegen_flags: <defaults>
</compile_context>

<pallas_src>
import functools

import jax
import jax.numpy as jnp
from jax.experimental import pallas as pl
from jax.experimental.pallas import tpu as pltpu


_NONLINEARITIES = {
    "relu": lambda y: jnp.maximum(y, 0.0),
    "tanh": jnp.tanh,
    "gelu": functools.partial(jax.nn.gelu, approximate=False),  # PyTorch default (erf)
    "identity": lambda y: y,
}


def _round_up(v, m):
    return (v + m - 1) // m * m


def _pick_tile_n(h_pad, tile_n):
    """Largest divisor of h_pad that is a multiple of 128 and <= tile_n."""
    tile_n = max(tile_n, 128)
    m = h_pad // 128
    best = 1
    d = 1
    while d <= m and d * 128 <= tile_n:
        if m % d == 0:
            best = d
        d += 1
    return best * 128


def _vmem_capacity_bytes():
    try:
        return int(pltpu.get_tpu_info().vmem_capacity_bytes)
    except Exception:
        return 64 * 2 ** 20   # conservative fallback (v7x per-TC physical VMEM)


# ----------------------------------------------------------------------------
# Path 1: small / medium models -- grid=(L,), per-layer weight block is
# auto-pipelined by Pallas; bf16 activation carry resident in VMEM scratch.
# ----------------------------------------------------------------------------
def _mlp_fused_kernel(x_ref, w_ref, b_ref, o_ref, h_ref, *,
                      layer_count, nonlinearity):
    act = _NONLINEARITIES[nonlinearity]
    w_dtype = w_ref.dtype
    l = pl.program_id(0)

    @pl.when(l == 0)
    def _():
        h_ref[...] = x_ref[...].astype(w_dtype)          # seed bf16 carry

    # Linear (MXU, f32 accumulation) + bias + Identity-reg + nonlinearity (f32).
    y = jnp.dot(h_ref[...], w_ref[0], preferred_element_type=jnp.float32)
    y = y + b_ref[0].astype(jnp.float32)                 # (1, H) broadcast
    y = act(y)

    h_ref[...] = y.astype(w_dtype)                       # bf16 carry for next layer

    @pl.when(l == layer_count - 1)
    def _():
        o_ref[...] = y.astype(o_ref.dtype)


def _mlp_fused(x_p, w_p, b_p, nonlinearity, vmem_cap):
    b_pad, h_pad = x_p.shape
    layer_count = w_p.shape[0]
    kernel = functools.partial(_mlp_fused_kernel, layer_count=layer_count,
                               nonlinearity=nonlinearity)

    wsz = w_p.dtype.itemsize
    xsz = x_p.dtype.itemsize
    need = (2 * h_pad * h_pad * wsz          # double-buffered weight block
            + 2 * h_pad * 4                  # double-buffered bias block
            + 2 * b_pad * h_pad * xsz * 2    # resident x / out blocks (2-buffered)
            + b_pad * h_pad * wsz            # bf16 carry scratch
            + (1 << 20))                     # compiler-scratch slack
    cp = dict(dimension_semantics=("arbitrary",))   # layer loop is sequential
    if need > 12 * 2 ** 20:
        cp["vmem_limit_bytes"] = int(min(max(2 * need, 32 * 2 ** 20),
                                         0.85 * vmem_cap))

    return pl.pallas_call(
        kernel,
        out_shape=jax.ShapeDtypeStruct((b_pad, h_pad), x_p.dtype),
        grid_spec=pltpu.PrefetchScalarGridSpec(
            num_scalar_prefetch=0,
            grid=(layer_count,),
            in_specs=[
                pl.BlockSpec((b_pad, h_pad), lambda l: (0, 0)),         # x (resident)
                pl.BlockSpec((1, h_pad, h_pad), lambda l: (l, 0, 0)),   # layer l weights
                pl.BlockSpec((1, 1, h_pad), lambda l: (l, 0, 0)),       # layer l bias
            ],
            out_specs=pl.BlockSpec((b_pad, h_pad), lambda l: (0, 0)),   # resident out
            scratch_shapes=[pltpu.VMEM((b_pad, h_pad), w_p.dtype)],     # bf16 carry
        ),
        compiler_params=pltpu.CompilerParams(**cp),
    )(x_p, w_p, b_p)


# ----------------------------------------------------------------------------
# Path 2: large models -- grid=(L,), bf16 ping-pong activation carry in VMEM,
# contiguous pre-tiled weight column tiles streamed from HBM with a manual
# double-buffered DMA, including cross-layer prefetch of the next layer's
# first tile.
# ----------------------------------------------------------------------------
def _mlp_tiled_kernel(x_ref, w_hbm, b_ref, o_ref,
                      h_ab, w_buf, dma_sem, *,
                      layer_count, tile_n, num_n, nonlinearity):
    act = _NONLINEARITIES[nonlinearity]
    w_dtype = w_buf.dtype
    l = pl.program_id(0)
    last = l == layer_count - 1
    cur = l % 2                    # carry slot read this layer
    nxt = (l + 1) % 2              # carry slot written this layer
    base = (l * num_n) % 2         # DMA slot parity at the start of this layer

    def w_tile_copy(layer, n, slot):
        # Contiguous (h_pad, tile_n) weight tile, HBM -> VMEM.
        return pltpu.make_async_copy(
            w_hbm.at[layer, n], w_buf.at[slot], dma_sem.at[slot])

    @pl.when(l == 0)
    def _():
        # Seed the bf16 carry with the padded input and start the very first
        # weight-tile DMA.  Later layers' tile 0 arrives via cross-layer
        # prefetch issued by the previous grid step.
        h_ab[0] = x_ref[...].astype(w_dtype)
        w_tile_copy(0, 0, 0).start()

    h = h_ab[cur]                  # full (b_pad, h_pad) bf16 activations

    for n in range(num_n):         # static trip count -> static column slices
        slot = (base + n) % 2
        next_slot = (base + n + 1) % 2

        w_tile_copy(l, n, slot).wait()
        if n + 1 < num_n:
            w_tile_copy(l, n + 1, next_slot).start()       # within-layer prefetch
        else:
            @pl.when(jnp.logical_not(last))
            def _():
                w_tile_copy(l + 1, 0, next_slot).start()   # cross-layer prefetch

        c0 = n * tile_n
        y = jnp.dot(h, w_buf[slot], preferred_element_type=jnp.float32)
        y = y + b_ref[0, :, c0:c0 + tile_n].astype(jnp.float32)   # (1, tile_n)
        # regularization = Identity (no-op), then the nonlinearity (f32 math).
        y = act(y)

        @pl.when(last)
        def _():
            o_ref[:, c0:c0 + tile_n] = y.astype(o_ref.dtype)

        @pl.when(jnp.logical_not(last))
        def _():
            h_ab[nxt, :, c0:c0 + tile_n] = y.astype(w_dtype)      # bf16 carry store


def _mlp_tiled(x_p, w_t, b_p, nonlinearity, tile_n, num_n, vmem_cap):
    b_pad, h_pad = x_p.shape
    layer_count = w_t.shape[0]
    w_dtype = w_t.dtype

    kernel = functools.partial(
        _mlp_tiled_kernel, layer_count=layer_count, tile_n=tile_n,
        num_n=num_n, nonlinearity=nonlinearity)

    wsz = w_t.dtype.itemsize
    xsz = x_p.dtype.itemsize
    need = (2 * b_pad * h_pad * wsz          # bf16 ping-pong carries
            + 2 * h_pad * tile_n * wsz       # double-buffered weight tile
            + 2 * b_pad * h_pad * xsz        # resident x block (double-buffered)
            + 2 * b_pad * h_pad * xsz        # resident out block (double-buffered)
            + 2 * h_pad * 4                  # per-layer bias block (double-buffered)
            + b_pad * h_pad * wsz            # in-flight activation value / temps
            + (1 << 20))                     # compiler-scratch slack
    cp = dict(dimension_semantics=("arbitrary",))   # layer loop is sequential
    if need > 12 * 2 ** 20:
        cp["vmem_limit_bytes"] = int(min(max(2 * need, 32 * 2 ** 20),
                                         0.85 * vmem_cap))

    return pl.pallas_call(
        kernel,
        out_shape=jax.ShapeDtypeStruct((b_pad, h_pad), x_p.dtype),
        grid_spec=pltpu.PrefetchScalarGridSpec(
            num_scalar_prefetch=0,
            grid=(layer_count,),
            in_specs=[
                pl.BlockSpec((b_pad, h_pad), lambda l: (0, 0)),    # x, resident
                pl.BlockSpec(memory_space=pl.ANY),                 # pre-tiled W in HBM
                pl.BlockSpec((1, 1, h_pad), lambda l: (l, 0, 0)),  # layer l bias
            ],
            out_specs=pl.BlockSpec((b_pad, h_pad), lambda l: (0, 0)),  # resident out
            scratch_shapes=[
                pltpu.VMEM((2, b_pad, h_pad), w_dtype),    # bf16 ping-pong carry
                pltpu.VMEM((2, h_pad, tile_n), w_dtype),   # weight tile double-buffer
                pltpu.SemaphoreType.DMA((2,)),
            ],
        ),
        compiler_params=pltpu.CompilerParams(**cp),
    )(x_p, w_t, b_p)


# ----------------------------------------------------------------------------
# Public wrapper.
# ----------------------------------------------------------------------------
@functools.partial(
    jax.jit,
    static_argnames=("nonlinearity", "param_dtype", "force_tiled", "tile_n"))
def mlp_block(x, weights, biases, *, nonlinearity="relu",
              param_dtype=jnp.bfloat16, force_tiled=False, tile_n=512):
    """x: (B, H); weights: (L, H, H) laid out [in, out]; biases: (L, H)."""
    B, H = x.shape
    L = weights.shape[0]
    assert weights.shape == (L, H, H)
    assert biases.shape == (L, H)

    h_pad = _round_up(H, 128)   # lane-dense
    b_pad = _round_up(B, 8)     # sublane-dense

    x_p = jnp.pad(x, ((0, b_pad - B), (0, h_pad - H)))
    # Cast to bf16 BEFORE padding (cheaper prep traffic); padded rows/cols are
    # zero so padded feature columns stay exactly zero through every layer.
    w_q = weights.astype(param_dtype)
    w_p = jnp.pad(w_q, ((0, 0), (0, h_pad - H), (0, h_pad - H)))
    b_p = jnp.pad(biases.astype(jnp.float32), ((0, 0), (0, h_pad - H)))
    b_p = b_p.reshape(L, 1, h_pad)

    vmem_cap = _vmem_capacity_bytes()

    wsz = jnp.dtype(param_dtype).itemsize
    xsz = x.dtype.itemsize
    fused_need = (2 * h_pad * h_pad * wsz + 2 * h_pad * 4
                  + 2 * b_pad * h_pad * xsz * 2 + b_pad * h_pad * wsz)
    fused_budget = min(int(0.4 * vmem_cap), 48 * 2 ** 20)
    use_fused = (not force_tiled) and fused_need <= fused_budget

    if use_fused:
        out_p = _mlp_fused(x_p, w_p, b_p, nonlinearity, vmem_cap)
    else:
        tn = _pick_tile_n(h_pad, tile_n)
        num_n = h_pad // tn
        # Pre-tile weights so each streamed (h_pad, tn) tile is contiguous in HBM.
        w_t = w_p.reshape(L, h_pad, num_n, tn).transpose(0, 2, 1, 3)
        out_p = _mlp_tiled(x_p, w_t, b_p, nonlinearity, tn, num_n, vmem_cap)
    return out_p[:B, :H]


def reference_mlp(x, weights, biases, nonlinearity="relu",
                  param_dtype=jnp.bfloat16):
    """Pure-JAX reference mirroring the kernel's bf16 quantization points."""
    act = _NONLINEARITIES[nonlinearity]
    h = x.astype(jnp.float32)
    wq = weights.astype(param_dtype)
    for i in range(weights.shape[0]):
        y = jnp.dot(h.astype(param_dtype), wq[i],
                    preferred_element_type=jnp.float32)
        y = y + biases[i].astype(jnp.float32)
        h = act(y)
    return h.astype(x.dtype)


if __name__ == "__main__":
    key = jax.random.PRNGKey(0)

    def make_params(k, L, H, B):
        kx, kw, kb = jax.random.split(k, 3)
        bound = 1.0 / (H ** 0.5)   # PyTorch nn.Linear default init scale
        x = jax.random.normal(kx, (B, H), dtype=jnp.float32)
        w = jax.random.uniform(kw, (L, H, H), minval=-bound, maxval=bound,
                               dtype=jnp.float32)
        b = jax.random.uniform(kb, (L, H), minval=-bound, maxval=bound,
                               dtype=jnp.float32)
        return x, w, b

    k1, k2, k3 = jax.random.split(key, 3)

    # 1) Module's nominal small config -> per-layer auto-pipelined path.
    x1, w1, b1 = make_params(k1, L=3, H=32, B=8)
    out1 = jax.block_until_ready(mlp_block(x1, w1, b1))
    ref1 = reference_mlp(x1, w1, b1)
    assert out1.shape == (8, 32)
    assert jnp.allclose(out1, ref1, atol=2e-3, rtol=2e-3), "fused path mismatch"

    # 2) Force the weight-streaming path, even tile count (2 column tiles):
    #    exercises ping-pong carry and within/cross-layer prefetch.
    x2, w2, b2 = make_params(k2, L=3, H=256, B=8)
    out2 = jax.block_until_ready(
        mlp_block(x2, w2, b2, force_tiled=True, tile_n=128))
    ref2 = reference_mlp(x2, w2, b2)
    assert out2.shape == (8, 256)
    assert jnp.allclose(out2, ref2, atol=2e-3, rtol=2e-3), \
        "tiled path (even tiles) mismatch"

    # 3) Force the weight-streaming path, odd tile count (3 column tiles):
    #    exercises cross-layer DMA slot-parity logic over 4 layers.
    x3, w3, b3 = make_params(k3, L=4, H=384, B=16)
    out3 = jax.block_until_ready(
        mlp_block(x3, w3, b3, force_tiled=True, tile_n=128))
    ref3 = reference_mlp(x3, w3, b3)
    assert out3.shape == (16, 384)
    assert jnp.allclose(out3, ref3, atol=2e-3, rtol=2e-3), \
        "tiled path (odd tiles) mismatch"

    print("KERNEL_OK")
</pallas_src>

<mosaic_0001>
module attributes {stable_mosaic.version = 11 : i64} {
  func.func @_mlp_fused_kernel(%arg0: i32, %arg1: memref<8x128xf32, #tpu.memory_space<vmem>>, %arg2: memref<1x128x128xbf16, #tpu.memory_space<vmem>>, %arg3: memref<1x1x128xf32, #tpu.memory_space<vmem>>, %arg4: memref<8x128xf32, #tpu.memory_space<vmem>>, %arg5: memref<8x128xbf16, #tpu.memory_space<vmem>>) attributes {dimension_semantics = [#tpu.dimension_semantics<arbitrary>], iteration_bounds = array<i64: 3>, scalar_prefetch = 0 : i64, scratch_operands = 1 : i64, tpu.core_type = #tpu.core_type<tc>, window_params = [{pipeline_mode = #tpu.pipeline_mode<synchronous>, transform_indices = @transform_0, window_bounds = array<i64: 8, 128>}, {transform_indices = @transform_1, window_bounds = array<i64: 1, 128, 128>}, {transform_indices = @transform_2, window_bounds = array<i64: 1, 1, 128>}, {pipeline_mode = #tpu.pipeline_mode<synchronous>, transform_indices = @transform_3, window_bounds = array<i64: 8, 128>}]} {
    %c0_i32 = arith.constant 0 : i32
    %0 = arith.cmpi eq, %arg0, %c0_i32 : i32
    %1 = arith.extui %0 : i1 to i32
    %c0_i32_0 = arith.constant 0 : i32
    %2 = arith.cmpi ne, %1, %c0_i32_0 : i32
    scf.if %2 {
      %c0_12 = arith.constant 0 : index
      %c0_13 = arith.constant 0 : index
      %18 = vector.load %arg1[%c0_12, %c0_13] : memref<8x128xf32, #tpu.memory_space<vmem>>, vector<8x128xf32>
      %19 = arith.truncf %18 : vector<8x128xf32> to vector<8x128xbf16>
      %c0_14 = arith.constant 0 : index
      %c0_15 = arith.constant 0 : index
      %20 = vector.load %arg5[%c0_14, %c0_15] : memref<8x128xbf16, #tpu.memory_space<vmem>>, vector<8x128xbf16>
      tpu.vector_store %arg5[%c0_14, %c0_15], %19 {strides = array<i32>} : memref<8x128xbf16, #tpu.memory_space<vmem>>, vector<8x128xbf16>,
    } else {
    }
    %c0 = arith.constant 0 : index
    %c0_1 = arith.constant 0 : index
    %3 = vector.load %arg5[%c0, %c0_1] : memref<8x128xbf16, #tpu.memory_space<vmem>>, vector<8x128xbf16>
    %c0_2 = arith.constant 0 : index
    %c0_3 = arith.constant 0 : index
    %c0_4 = arith.constant 0 : index
    %4 = vector.load %arg2[%c0_2, %c0_3, %c0_4] : memref<1x128x128xbf16, #tpu.memory_space<vmem>>, vector<1x128x128xbf16>
    %5 = vector.shape_cast %4 : vector<1x128x128xbf16> to vector<128x128xbf16>
    %cst = arith.constant dense<0.000000e+00> : vector<8x128xf32>
    %6 = tpu.matmul %3, %5, %cst {dimension_numbers = #tpu.dot_dimension_numbers<[1], [0], [0], [1], [0, 0, 1, 1], [], []>} : vector<8x128xbf16>, vector<128x128xbf16>, vector<8x128xf32> -> vector<8x128xf32>
    %c0_5 = arith.constant 0 : index
    %c0_6 = arith.constant 0 : index
    %c0_7 = arith.constant 0 : index
    %7 = vector.load %arg3[%c0_5, %c0_6, %c0_7] : memref<1x1x128xf32, #tpu.memory_space<vmem>>, vector<1x1x128xf32>
    %8 = vector.shape_cast %7 : vector<1x1x128xf32> to vector<1x128xf32>
    %9 = vector.broadcast %8 : vector<1x128xf32> to vector<8x128xf32>
    %10 = arith.addf %6, %9 : vector<8x128xf32>
    %cst_8 = arith.constant 0.000000e+00 : f32
    %11 = vector.broadcast %cst_8 : f32 to vector<8x128xf32>
    %12 = arith.maximumf %10, %11 : vector<8x128xf32>
    %13 = arith.truncf %12 : vector<8x128xf32> to vector<8x128xbf16>
    %c0_9 = arith.constant 0 : index
    %c0_10 = arith.constant 0 : index
    %14 = vector.load %arg5[%c0_9, %c0_10] : memref<8x128xbf16, #tpu.memory_space<vmem>>, vector<8x128xbf16>
    tpu.vector_store %arg5[%c0_9, %c0_10], %13 {strides = array<i32>} : memref<8x128xbf16, #tpu.memory_space<vmem>>, vector<8x128xbf16>,
    %c2_i32 = arith.constant 2 : i32
    %15 = arith.cmpi eq, %arg0, %c2_i32 : i32
    %16 = arith.extui %15 : i1 to i32
    %c0_i32_11 = arith.constant 0 : i32
    %17 = arith.cmpi ne, %16, %c0_i32_11 : i32
    scf.if %17 {
      %c0_12 = arith.constant 0 : index
      %c0_13 = arith.constant 0 : index
      %18 = vector.load %arg4[%c0_12, %c0_13] : memref<8x128xf32, #tpu.memory_space<vmem>>, vector<8x128xf32>
      tpu.vector_store %arg4[%c0_12, %c0_13], %12 {strides = array<i32>} : memref<8x128xf32, #tpu.memory_space<vmem>>, vector<8x128xf32>,
    } else {
    }
    return
  }
  func.func @transform_0(%arg0: i32) -> (i32, i32) {
    %c0_i32 = arith.constant 0 : i32
    %c0_i32_0 = arith.constant 0 : i32
    %c0_i32_1 = arith.constant 0 : i32
    return %c0_i32, %c0_i32_0 : i32, i32
  }
  func.func @transform_1(%arg0: i32) -> (i32, i32, i32) {
    %c0_i32 = arith.constant 0 : i32
    %c0_i32_0 = arith.constant 0 : i32
    %c0_i32_1 = arith.constant 0 : i32
    return %arg0, %c0_i32, %c0_i32_0 : i32, i32, i32
  }
  func.func @transform_2(%arg0: i32) -> (i32, i32, i32) {
    %c0_i32 = arith.constant 0 : i32
    %c0_i32_0 = arith.constant 0 : i32
    %c0_i32_1 = arith.constant 0 : i32
    return %arg0, %c0_i32, %c0_i32_0 : i32, i32, i32
  }
  func.func @transform_3(%arg0: i32) -> (i32, i32) {
    %c0_i32 = arith.constant 0 : i32
    %c0_i32_0 = arith.constant 0 : i32
    %c0_i32_1 = arith.constant 0 : i32
    return %c0_i32, %c0_i32_0 : i32, i32
  }
}

</mosaic_0001>

<bundles_post_ra>
// kernel: mlp_block.1
= control target key start
LH: loop header
LB: loop body
LE: loop exit
PB: predicated region body
PF: predicated region fallthrough
CT: control target
= control target key end

     0   :  { %8 = vsyncpa [#allocation4], 0  ;;  %s489_s12 = smov 0   ;;  %s546_s0 = inlined_call_operand.vmem [shape: f32[8,128], index: 0, kind: input, shape index: {}]   ;;  %s547_s1 = inlined_call_operand.vmem [shape: bf16[3,128,128], index: 1, kind: input, shape index: {}]   ;;  %s548_s2 = inlined_call_operand.vmem [shape: f32[3,1,128], index: 2, kind: input, shape index: {}]   ;;  %s549_s3 = inlined_call_operand.hbm [shape: f32[8,128], index: 3, kind: output, shape index: {}]  }
   0x1 LB: > { %s495_s13 = sadd.s32 4294967295, %s464_s12   ;;  %p357_p0 = scmp.ge.s32.totalorder %s464_s12, 1  ;;  %s464_s12 = sphi %s489_s12, %s14_s12  }
   0x2   : > { %p141_p1 = scmp.lt.s32.totalorder %s464_s12, 4 }
   0x4   : > { %p142_p2 = pnand %p357_p0, %p141_p1 }
   0x5   : > { %p163_p3 = scmp.lt.s32.totalorder (!%p142_p2), %s495_s13, 2  ;;  %p360_p4 = scmp.ne.s32.totalorder (!%p142_p2), %s495_s13, 0 }
   0x6   : > { %145 = sbr.rel (%p142_p2) target bundleno = 270 (0x10e), region = 32 }
   0xb   : > { %s501_s14 = scalar_select %p163_p3, %s495_s13, 2 }
   0xc   : > { %175 = sbr.rel (%p360_p4) target bundleno = 21 (0x15), region = 36 }
   0xd   : > { %s375_s15 = sshll.u32 %s501_s14, 6  ;;  %s170_s18 = scalar_lea.vmem %s548_s2, %s501_s14 }
   0xe   : > { %s511_s21 = scalar_lea.vmem %s547_s1, %s375_s15 }
  0x11   : > { %v176_v0 = vld [vmem:[%s546_s0] sm:$0xff] }
  0x12   : > { %v177_v1 = vpack.c.bf16 %v176_v0, %v176_v0 }
  0x14   : > { %178 = vst [vmem:[#allocation2] sm:$0xf] %v177_v1 }
  0x15 PF: > { %v422_v2 = vld [vmem:[%s511_s21 + $0x38] sm:$0xff]   ;;  %v466_v3 = vmov 0.0   ;;  %v423_v4 = vld [vmem:[%s511_s21 + $0x30] sm:$0xff]   ;;  %vm467_vm0 = vmmov 0   ;;  %v424_v5 = vld [vmem:[%s511_s21 + $0x28] sm:$0xff]   ;;  %p370_p5 = scmp.ne.s32.totalorder %s495_s13, 2 }
  0x16   : > { %385 = vmatprep.subr.bf16.mxu0 %v466_v3  ;;  %401 = vmatprep.mubr.msk.bf16.mxu0 %vm467_vm0, %v466_v3  ;;  %v425_v6 = vld [vmem:[%s511_s21 + $0x20] sm:$0xff]   ;;  %v426_v7 = vld [vmem:[%s511_s21 + $0x18] sm:$0xff]   ;;  %v427_v8 = vld [vmem:[%s511_s21 + $0x10] sm:$0xff]  }
  0x17   : > { %386 = vmatpush3.bf16.msra.mxu0 %v422_v2  ;;  %v428_v9 = vld [vmem:[%s511_s21 + $0x8] sm:$0xff]   ;;  %v429_v10 = vld [vmem:[%s511_s21] sm:$0xff]  }
  0x18   : > { %387 = vmatprep.subr.bf16.mxu0 %v466_v3  ;;  %v361_v12 = vld [vmem:[%s170_s18] ss:$0 sm:$0xff] }
  0x1b   : > { %388 = vmatpush3.bf16.msra.mxu0 %v423_v4  ;;  %v179_v11 = vld [vmem:[#allocation2] sm:$0xf] }
  0x1c   : > { %389 = vmatprep.subr.bf16.mxu0 %v466_v3 }
  0x1f   : > { %390 = vmatpush3.bf16.msra.mxu0 %v424_v5 }
  0x20   : > { %391 = vmatprep.subr.bf16.mxu0 %v466_v3 }
  0x23   : > { %392 = vmatpush3.bf16.msra.mxu0 %v425_v6 }
  0x24   : > { %393 = vmatprep.subr.bf16.mxu0 %v466_v3 }
  0x27   : > { %394 = vmatpush3.bf16.msra.mxu0 %v426_v7 }
  0x28   : > { %395 = vmatprep.subr.bf16.mxu0 %v466_v3 }
  0x2b   : > { %396 = vmatpush3.bf16.msra.mxu0 %v427_v8 }
  0x2c   : > { %397 = vmatprep.subr.bf16.mxu0 %v466_v3 }
  0x2f   : > { %398 = vmatpush3.bf16.msra.mxu0 %v428_v9 }
  0x30   : > { %399 = vmatprep.subr.bf16.mxu0 %v466_v3 }
  0x33   : > { %400 = vmatpush3.bf16.msra.mxu0 %v429_v10 }
  0x36   : > { %402 = vmatmul.mubr.bf16.vlgmr.msra.gmra.mxu0 %v179_v11 }
  0xf6   : > { %v285_v13 = vpop.f32.mrf.mxu0 }
  0xf7   : > { %v286_v14 = vadd.f32 %v361_v12, %v285_v13 }
  0xf8   : > { %v403_v15 = vpop.f32.mrf.mxu0 }
  0xf9   : > { %v291_v16 = vmax.f32 %v286_v14, 0.0  ;;  %297 = sbr.rel (%p370_p5) target bundleno = 255 (0xff), region = 40 }
  0xfa   : > { %v288_v17 = vpop.f32.mrf.mxu0 }
  0xfb   : > { %v292_v18 = vpack.c.bf16 %v291_v16, %v291_v16 }
  0xfc   : > { %v404_v19 = vpop.f32.mrf.mxu0 }
  0xfd   : > { %293 = vst [vmem:[#allocation2] sm:$0xf] %v292_v18 }
  0xfe   : > { %298 = vst [vmem:[#allocation3] sm:$0xff] %v291_v16 }
  0xff PF: > { %p409_p6 = scmp.eq.s32.totalorder %s495_s13, 2  ;;  %s468_s26 = smov [#allocation3]  }
 0x100   : > { %s306_s27 = sshll.u32 %s468_s26, 4  ;;  %s307_s27 = int_to_ptr.vmem [resolvable:$true] %s306_s27 }
 0x101   : > { %s430_s28 = scalar_lea.vmem %s307_s27, 128  ;;  %p437_p10 = scmp.lt.s32.totalorder %s307_s27, %s307_s27 }
 0x102   : > { %p431_p7 = scmp.ne.s32.totalorder %s307_s27, %s430_s28  ;;  %p438_p11 = scmp.lt.s32.totalorder %s430_s28, %s430_s28 }
 0x104   : > { %p432_p8 = pnand %p431_p7, %p409_p6  ;;  %p439_p12 = por %p438_p11, %p437_p10 }
 0x106   : > { %p433_p9 = pneg %p432_p8 }
 0x108   : > { %p440_p13 = pnand %p439_p12, %p433_p9 }
 0x10a   : > { %443 = shalt.err (!%p440_p13)
}
 0x10b   : > { %406 = dma.vmem_to_hbm [thread:$0]  (%p409_p6), %s307_s27, 128, %s549_s3, [#allocation4]  }
 0x10c   : > { %459 = dma.done.wait (%p409_p6), [#allocation4], 128  }
 0x10d   : > { %461 = vsyncadd (%p409_p6), [#allocation4], 4294967168 }
 0x10e PF: > { %s14_s12 = sadd.s32 1, %s464_s12  }
 0x10f   : > { %p11_p0 = scmp.ge.s32.totalorder %s14_s12, 5  }
 0x111   :  { %13 = sbr.rel (!%p11_p0) target bundleno = 1 (0x1), region = 70 }
 0x116   :  { %319 = vsyncpa [#allocation4], 1 }
 0x117   :  { %321 = vsyncpa [#allocation4 + $0x1], 1 }

</bundles_post_ra>
